<compile_context>
chip_gen: v5e
topology: v5e:2x2
jax: 0.10.0
libtpu: 0.0.40
codegen_flags: <defaults>
</compile_context>

<pallas_src>
import jax
import jax.numpy as jnp
from jax import lax
from jax.experimental import pallas as pl
from jax.experimental.pallas import tpu as pltpu

EPSILON = 1e-10          # EPISILON in the torch code
NCE_TEMPERATURE = 0.1    # CCL uses nce(temperature=0.1)
JSD_T = 1.0              # CCL uses JSDLoss(T=1)
NORM_EPS = 1e-12         # F.normalize default eps


def _log_softmax(x):
    m = jnp.max(x, axis=1, keepdims=True)
    z = x - m
    return z - jnp.log(jnp.sum(jnp.exp(z), axis=1, keepdims=True))


def ccl_kernel(f_ref, tcol_ref, trow_ref, l_ref, out_ref):
    f_all = f_ref[...]                      # (2B, D): [fs; ft]
    B = f_all.shape[0] // 2
    fs = f_all[:B]                          # static slice on a sublane boundary
    ft = f_all[B:]

    # ---- nce loss (temperature = 0.1) ----
    # F.normalize(x, dim=1) = x / max(||x||, eps) == x * rsqrt(max(||x||^2, eps^2))
    f1 = fs * lax.rsqrt(jnp.maximum(jnp.sum(fs * fs, axis=1, keepdims=True),
                                    NORM_EPS * NORM_EPS))
    f2 = ft * lax.rsqrt(jnp.maximum(jnp.sum(ft * ft, axis=1, keepdims=True),
                                    NORM_EPS * NORM_EPS))

    # Unit-norm identity: dist[i,j] = 2 - 2*f1_i.f2_j  =>  cos = f1 @ f2^T
    cos = lax.dot_general(f1, f2, dimension_numbers=(((1,), (1,)), ((), ())),
                          preferred_element_type=jnp.float32)          # (B, B)

    logits = cos * (1.0 / NCE_TEMPERATURE)
    m = jnp.max(logits, axis=1, keepdims=True)
    e = jnp.exp(logits - m)
    pred = e / jnp.sum(e, axis=1, keepdims=True)                       # softmax, dim=1

    # Integer label compare: pos = same target (includes diagonal), neg = different.
    pos_mask = (tcol_ref[...] == trow_ref[...]).astype(jnp.float32)    # (B, B)
    neg_mask = 1.0 - pos_mask

    log_pos = -jnp.log(pred + EPSILON) * pos_mask
    log_neg = -jnp.log(1.0 - pred + EPSILON) * neg_mask
    # NOTE: if every sample shares one label, neg count is 0 and this is inf/NaN,
    # exactly matching the PyTorch original (no extra guard, to preserve semantics).
    per_row = (jnp.sum(log_pos, axis=1, keepdims=True)
               / jnp.sum(pos_mask, axis=1, keepdims=True)
               + jnp.sum(log_neg, axis=1, keepdims=True)
               / jnp.sum(neg_mask, axis=1, keepdims=True))             # (B, 1)
    nce_loss = jnp.sum(per_row) * (1.0 / B)

    # ---- JSD loss (T = 1) ----
    l_all = l_ref[...]                      # (2B, C): [logit_s; logit_t]
    ys = l_all[:B]
    yt = l_all[B:]
    if JSD_T != 1.0:                        # static Python constant; no-op for T=1
        ys = ys / JSD_T
        yt = yt / JSD_T
    lsm_s = _log_softmax(ys)
    lsm_t = _log_softmax(yt)
    dl = lsm_t - lsm_s
    # 0.5 * (KL(t||s) + KL(s||t)) = 0.5 * sum((p_t - p_s) * (log p_t - log p_s))
    jsd_loss = (0.5 * jnp.sum((jnp.exp(lsm_t) - jnp.exp(lsm_s)) * dl)
                * (JSD_T * JSD_T) * (1.0 / B))

    out_ref[0, 0] = nce_loss + jsd_loss


@jax.jit
def ccl_forward(fs, ft, target, logit_s, logit_t):
    B = fs.shape[0]
    f_cat = jnp.concatenate([fs, ft], axis=0)               # (2B, D)
    l_cat = jnp.concatenate([logit_s, logit_t], axis=0)     # (2B, C)
    t_i32 = target.astype(jnp.int32)
    t_col = t_i32.reshape(B, 1)
    t_row = t_i32.reshape(1, B)

    vmem = pl.BlockSpec(memory_space=pltpu.MemorySpace.VMEM)
    smem = pl.BlockSpec(memory_space=pltpu.MemorySpace.SMEM)
    out = pl.pallas_call(
        ccl_kernel,
        out_shape=jax.ShapeDtypeStruct((1, 1), jnp.float32),
        in_specs=[vmem, vmem, vmem, vmem],
        out_specs=smem,
    )(f_cat, t_col, t_row, l_cat)
    return out[0, 0]


def ccl_reference(fs, ft, target, logit_s, logit_t):
    """Pure-JAX reference mirroring the PyTorch CCL module."""
    f1 = fs / jnp.maximum(jnp.linalg.norm(fs, axis=1, keepdims=True), NORM_EPS)
    f2 = ft / jnp.maximum(jnp.linalg.norm(ft, axis=1, keepdims=True), NORM_EPS)
    dist = jnp.sum((f1[:, None, :] - f2[None, :, :]) ** 2, axis=2)
    cos = 1.0 - 0.5 * dist
    pred = jax.nn.softmax(cos / NCE_TEMPERATURE, axis=1)
    pos = (target[:, None] == target[None, :]).astype(jnp.float32)
    neg = 1.0 - pos
    lp = -jnp.log(pred + EPSILON) * pos
    ln = -jnp.log(1.0 - pred + EPSILON) * neg
    row = lp.sum(1) / pos.sum(1) + ln.sum(1) / neg.sum(1)
    nce_loss = row.mean()

    lsm_s = jax.nn.log_softmax(logit_s / JSD_T, axis=1)
    lsm_t = jax.nn.log_softmax(logit_t / JSD_T, axis=1)
    sm_s, sm_t = jnp.exp(lsm_s), jnp.exp(lsm_t)
    B = logit_s.shape[0]
    kl_st = jnp.sum(sm_t * (lsm_t - lsm_s)) * (JSD_T ** 2) / B
    kl_ts = jnp.sum(sm_s * (lsm_s - lsm_t)) * (JSD_T ** 2) / B
    return nce_loss + 0.5 * (kl_st + kl_ts)


if __name__ == "__main__":
    B, D, C = 8, 32, 16
    key = jax.random.PRNGKey(0)
    k1, k2, k3, k4 = jax.random.split(key, 4)
    fs = jax.random.normal(k1, (B, D), dtype=jnp.float32)
    ft = jax.random.normal(k2, (B, D), dtype=jnp.float32)
    logit_s = jax.random.normal(k3, (B, C), dtype=jnp.float32)
    logit_t = jax.random.normal(k4, (B, C), dtype=jnp.float32)
    target = jnp.array([0, 1, 0, 1, 2, 2, 0, 1], dtype=jnp.int32)

    loss = ccl_forward(fs, ft, target, logit_s, logit_t)
    jax.block_until_ready(loss)

    ref = ccl_reference(fs, ft, target, logit_s, logit_t)
    assert jnp.allclose(loss, ref, rtol=1e-4, atol=1e-4), (loss, ref)

    print("KERNEL_OK")
</pallas_src>

<mosaic_0001>
module attributes {stable_mosaic.version = 11 : i64} {
  func.func @ccl_kernel(%arg0: memref<16x32xf32, #tpu.memory_space<vmem>>, %arg1: memref<8x1xi32, #tpu.memory_space<vmem>>, %arg2: memref<1x8xi32, #tpu.memory_space<vmem>>, %arg3: memref<16x16xf32, #tpu.memory_space<vmem>>, %arg4: memref<1x1xf32, #tpu.memory_space<smem>>) attributes {dimension_semantics = [], scalar_prefetch = 0 : i64, scratch_operands = 0 : i64, tpu.core_type = #tpu.core_type<tc>} {
    %c0 = arith.constant 0 : index
    %c0_0 = arith.constant 0 : index
    %0 = vector.load %arg0[%c0, %c0_0] : memref<16x32xf32, #tpu.memory_space<vmem>>, vector<16x32xf32>
    %1 = vector.extract_strided_slice %0 {offsets = [0, 0], sizes = [8, 32], strides = [1, 1]} : vector<16x32xf32> to vector<8x32xf32>
    %2 = vector.extract_strided_slice %0 {offsets = [8, 0], sizes = [8, 32], strides = [1, 1]} : vector<16x32xf32> to vector<8x32xf32>
    %3 = arith.mulf %1, %1 : vector<8x32xf32>
    %cst = arith.constant dense<0.000000e+00> : vector<8xf32>
    %4 = vector.multi_reduction <add>, %3, %cst [1] : vector<8x32xf32> to vector<8xf32>
    %5 = vector.shape_cast %4 : vector<8xf32> to vector<8x1xf32>
    %cst_1 = arith.constant 1.000000e-24 : f32
    %6 = vector.broadcast %cst_1 : f32 to vector<8x1xf32>
    %7 = arith.maximumf %5, %6 : vector<8x1xf32>
    %8 = math.rsqrt %7 : vector<8x1xf32>
    %9 = vector.broadcast %8 : vector<8x1xf32> to vector<8x32xf32>
    %10 = arith.mulf %1, %9 : vector<8x32xf32>
    %11 = arith.mulf %2, %2 : vector<8x32xf32>
    %cst_2 = arith.constant dense<0.000000e+00> : vector<8xf32>
    %12 = vector.multi_reduction <add>, %11, %cst_2 [1] : vector<8x32xf32> to vector<8xf32>
    %13 = vector.shape_cast %12 : vector<8xf32> to vector<8x1xf32>
    %cst_3 = arith.constant 1.000000e-24 : f32
    %14 = vector.broadcast %cst_3 : f32 to vector<8x1xf32>
    %15 = arith.maximumf %13, %14 : vector<8x1xf32>
    %16 = math.rsqrt %15 : vector<8x1xf32>
    %17 = vector.broadcast %16 : vector<8x1xf32> to vector<8x32xf32>
    %18 = arith.mulf %2, %17 : vector<8x32xf32>
    %cst_4 = arith.constant dense<0.000000e+00> : vector<8x8xf32>
    %19 = tpu.matmul %10, %18, %cst_4 {dimension_numbers = #tpu.dot_dimension_numbers<[1], [1], [0], [0], [0, 0, 1, 0], [], []>} : vector<8x32xf32>, vector<8x32xf32>, vector<8x8xf32> -> vector<8x8xf32>
    %cst_5 = arith.constant 1.000000e+01 : f32
    %20 = vector.broadcast %cst_5 : f32 to vector<8x8xf32>
    %21 = arith.mulf %19, %20 : vector<8x8xf32>
    %cst_6 = arith.constant dense<0xFF800000> : vector<8xf32>
    %22 = vector.multi_reduction <maximumf>, %21, %cst_6 [1] : vector<8x8xf32> to vector<8xf32>
    %23 = vector.shape_cast %22 : vector<8xf32> to vector<8x1xf32>
    %24 = vector.broadcast %23 : vector<8x1xf32> to vector<8x8xf32>
    %25 = arith.subf %21, %24 : vector<8x8xf32>
    %26 = math.exp %25 : vector<8x8xf32>
    %cst_7 = arith.constant dense<0.000000e+00> : vector<8xf32>
    %27 = vector.multi_reduction <add>, %26, %cst_7 [1] : vector<8x8xf32> to vector<8xf32>
    %28 = vector.shape_cast %27 : vector<8xf32> to vector<8x1xf32>
    %29 = vector.broadcast %28 : vector<8x1xf32> to vector<8x8xf32>
    %30 = arith.divf %26, %29 : vector<8x8xf32>
    %c0_8 = arith.constant 0 : index
    %c0_9 = arith.constant 0 : index
    %31 = vector.load %arg1[%c0_8, %c0_9] : memref<8x1xi32, #tpu.memory_space<vmem>>, vector<8x1xi32>
    %c0_10 = arith.constant 0 : index
    %c0_11 = arith.constant 0 : index
    %32 = vector.load %arg2[%c0_10, %c0_11] : memref<1x8xi32, #tpu.memory_space<vmem>>, vector<1x8xi32>
    %33 = vector.broadcast %31 : vector<8x1xi32> to vector<8x8xi32>
    %34 = vector.broadcast %32 : vector<1x8xi32> to vector<8x8xi32>
    %35 = arith.cmpi eq, %33, %34 : vector<8x8xi32>
    %36 = arith.extui %35 : vector<8x8xi1> to vector<8x8xi32>
    %37 = arith.sitofp %36 : vector<8x8xi32> to vector<8x8xf32>
    %cst_12 = arith.constant 1.000000e+00 : f32
    %38 = vector.broadcast %cst_12 : f32 to vector<8x8xf32>
    %39 = arith.subf %38, %37 : vector<8x8xf32>
    %cst_13 = arith.constant 1.000000e-10 : f32
    %40 = vector.broadcast %cst_13 : f32 to vector<8x8xf32>
    %41 = arith.addf %30, %40 : vector<8x8xf32>
    %42 = math.log %41 : vector<8x8xf32>
    %cst_14 = arith.constant 0.000000e+00 : f32
    %43 = vector.broadcast %cst_14 : f32 to vector<8x8xf32>
    %44 = arith.subf %43, %42 : vector<8x8xf32>
    %45 = arith.mulf %44, %37 : vector<8x8xf32>
    %cst_15 = arith.constant 1.000000e+00 : f32
    %46 = vector.broadcast %cst_15 : f32 to vector<8x8xf32>
    %47 = arith.subf %46, %30 : vector<8x8xf32>
    %cst_16 = arith.constant 1.000000e-10 : f32
    %48 = vector.broadcast %cst_16 : f32 to vector<8x8xf32>
    %49 = arith.addf %47, %48 : vector<8x8xf32>
    %50 = math.log %49 : vector<8x8xf32>
    %cst_17 = arith.constant 0.000000e+00 : f32
    %51 = vector.broadcast %cst_17 : f32 to vector<8x8xf32>
    %52 = arith.subf %51, %50 : vector<8x8xf32>
    %53 = arith.mulf %52, %39 : vector<8x8xf32>
    %cst_18 = arith.constant dense<0.000000e+00> : vector<8xf32>
    %54 = vector.multi_reduction <add>, %45, %cst_18 [1] : vector<8x8xf32> to vector<8xf32>
    %55 = vector.shape_cast %54 : vector<8xf32> to vector<8x1xf32>
    %cst_19 = arith.constant dense<0.000000e+00> : vector<8xf32>
    %56 = vector.multi_reduction <add>, %37, %cst_19 [1] : vector<8x8xf32> to vector<8xf32>
    %57 = vector.shape_cast %56 : vector<8xf32> to vector<8x1xf32>
    %58 = arith.divf %55, %57 : vector<8x1xf32>
    %cst_20 = arith.constant dense<0.000000e+00> : vector<8xf32>
    %59 = vector.multi_reduction <add>, %53, %cst_20 [1] : vector<8x8xf32> to vector<8xf32>
    %60 = vector.shape_cast %59 : vector<8xf32> to vector<8x1xf32>
    %cst_21 = arith.constant dense<0.000000e+00> : vector<8xf32>
    %61 = vector.multi_reduction <add>, %39, %cst_21 [1] : vector<8x8xf32> to vector<8xf32>
    %62 = vector.shape_cast %61 : vector<8xf32> to vector<8x1xf32>
    %63 = arith.divf %60, %62 : vector<8x1xf32>
    %64 = arith.addf %58, %63 : vector<8x1xf32>
    %65 = vector.shape_cast %64 : vector<8x1xf32> to vector<1x8x1xf32>
    %cst_22 = arith.constant dense<0.000000e+00> : vector<1xf32>
    %66 = vector.multi_reduction <add>, %65, %cst_22 [1, 2] : vector<1x8x1xf32> to vector<1xf32>
    %67 = vector.shape_cast %66 : vector<1xf32> to vector<1x1x1xf32>
    %68 = vector.extract %67[0, 0, 0] : f32 from vector<1x1x1xf32>
    %cst_23 = arith.constant 1.250000e-01 : f32
    %69 = arith.mulf %68, %cst_23 : f32
    %c0_24 = arith.constant 0 : index
    %c0_25 = arith.constant 0 : index
    %70 = vector.load %arg3[%c0_24, %c0_25] : memref<16x16xf32, #tpu.memory_space<vmem>>, vector<16x16xf32>
    %71 = vector.extract_strided_slice %70 {offsets = [0, 0], sizes = [8, 16], strides = [1, 1]} : vector<16x16xf32> to vector<8x16xf32>
    %72 = vector.extract_strided_slice %70 {offsets = [8, 0], sizes = [8, 16], strides = [1, 1]} : vector<16x16xf32> to vector<8x16xf32>
    %cst_26 = arith.constant dense<0xFF800000> : vector<8xf32>
    %73 = vector.multi_reduction <maximumf>, %71, %cst_26 [1] : vector<8x16xf32> to vector<8xf32>
    %74 = vector.shape_cast %73 : vector<8xf32> to vector<8x1xf32>
    %75 = vector.broadcast %74 : vector<8x1xf32> to vector<8x16xf32>
    %76 = arith.subf %71, %75 : vector<8x16xf32>
    %77 = math.exp %76 : vector<8x16xf32>
    %cst_27 = arith.constant dense<0.000000e+00> : vector<8xf32>
    %78 = vector.multi_reduction <add>, %77, %cst_27 [1] : vector<8x16xf32> to vector<8xf32>
    %79 = vector.shape_cast %78 : vector<8xf32> to vector<8x1xf32>
    %80 = math.log %79 : vector<8x1xf32>
    %81 = vector.broadcast %80 : vector<8x1xf32> to vector<8x16xf32>
    %82 = arith.subf %76, %81 : vector<8x16xf32>
    %cst_28 = arith.constant dense<0xFF800000> : vector<8xf32>
    %83 = vector.multi_reduction <maximumf>, %72, %cst_28 [1] : vector<8x16xf32> to vector<8xf32>
    %84 = vector.shape_cast %83 : vector<8xf32> to vector<8x1xf32>
    %85 = vector.broadcast %84 : vector<8x1xf32> to vector<8x16xf32>
    %86 = arith.subf %72, %85 : vector<8x16xf32>
    %87 = math.exp %86 : vector<8x16xf32>
    %cst_29 = arith.constant dense<0.000000e+00> : vector<8xf32>
    %88 = vector.multi_reduction <add>, %87, %cst_29 [1] : vector<8x16xf32> to vector<8xf32>
    %89 = vector.shape_cast %88 : vector<8xf32> to vector<8x1xf32>
    %90 = math.log %89 : vector<8x1xf32>
    %91 = vector.broadcast %90 : vector<8x1xf32> to vector<8x16xf32>
    %92 = arith.subf %86, %91 : vector<8x16xf32>
    %93 = arith.subf %92, %82 : vector<8x16xf32>
    %94 = math.exp %92 : vector<8x16xf32>
    %95 = math.exp %82 : vector<8x16xf32>
    %96 = arith.subf %94, %95 : vector<8x16xf32>
    %97 = arith.mulf %96, %93 : vector<8x16xf32>
    %98 = vector.shape_cast %97 : vector<8x16xf32> to vector<1x8x16xf32>
    %cst_30 = arith.constant dense<0.000000e+00> : vector<1xf32>
    %99 = vector.multi_reduction <add>, %98, %cst_30 [1, 2] : vector<1x8x16xf32> to vector<1xf32>
    %100 = vector.shape_cast %99 : vector<1xf32> to vector<1x1x1xf32>
    %101 = vector.extract %100[0, 0, 0] : f32 from vector<1x1x1xf32>
    %cst_31 = arith.constant 5.000000e-01 : f32
    %102 = arith.mulf %cst_31, %101 : f32
    %cst_32 = arith.constant 1.000000e+00 : f32
    %103 = arith.mulf %102, %cst_32 : f32
    %cst_33 = arith.constant 1.250000e-01 : f32
    %104 = arith.mulf %103, %cst_33 : f32
    %105 = arith.addf %69, %104 : f32
    %c0_34 = arith.constant 0 : index
    %c0_35 = arith.constant 0 : index
    %106 = memref.load %arg4[%c0_34, %c0_35] : memref<1x1xf32, #tpu.memory_space<smem>>
    memref.store %105, %arg4[%c0_34, %c0_35] : memref<1x1xf32, #tpu.memory_space<smem>>
    return
  }
}

</mosaic_0001>

<bundles_post_ra>
// kernel: ccl_forward.1
= control target key start
LH: loop header
LB: loop body
LE: loop exit
PB: predicated region body
PF: predicated region fallthrough
CT: control target
= control target key end

     0   :  { %vm21_vm0 = vcmask 261120   ;;  %s363_s0 = inlined_call_operand.vmem [shape: f32[16,32], index: 0, kind: input, shape index: {}]   ;;  %s364_s1 = inlined_call_operand.vmem [shape: s32[8,1], index: 1, kind: input, shape index: {}]   ;;  %s365_s2 = inlined_call_operand.vmem [shape: s32[1,8], index: 2, kind: input, shape index: {}]   ;;  %s366_s3 = inlined_call_operand.vmem [shape: f32[16,16], index: 3, kind: input, shape index: {}]   ;;  %s367_s4 = inlined_call_operand.hbm [shape: f32[1,1], index: 4, kind: output, shape index: {}]  }
   0x1   :  { %v19_v0 = vld [vmem:[%s363_s0 + $0x8] sm:$0xff] }
   0x2   :  { %v37_v1 = vmul.f32 %v19_v0, %v19_v0 }
   0x3   :  { %9 = vsyncpa [#allocation3], 0  ;;  %v18_v2 = vld [vmem:[%s363_s0] sm:$0xff]  ;;  %vm183_vm1 = vcmask 130048   ;;  %v182_v10 = vld [vmem:[%s366_s3 + $0x8] sm:$0xff]  ;;  %vm80_vm8 = vcmask 64512  }
   0x4   :  { %v38_v3 = vsel %vm21_vm0, %v37_v1, 0.0  ;;  %v20_v4 = vmul.f32 %v18_v2, %v18_v2  ;;  %v181_v6 = vld [vmem:[%s366_s3] sm:$0xff]  ;;  %v196_v11 = vsel %vm183_vm1, %v182_v10, -inf  ;;  %v299_v40 = vmov 0   ;;  %s235_s28 = sshll.u32 %s367_s4, 4  ;;  %s301_s6 = smov [#allocation2]   ;;  %s236_s28 = int_to_ptr.hbm [resolvable:$true] %s235_s28 }
   0x5   :  { %39 = vadd.xlane.f32.xlu0 %v38_v3  ;;  %v184_v8 = vsel %vm183_vm1, %v181_v6, -inf  ;;  %v105_v39 = vld [vmem:[%s364_s1] sm:$0xff]  ;;  %v300_v52 = vmov 0.0  }
   0x6   :  { %v22_v5 = vsel %vm21_vm0, %v20_v4, 0.0  ;;  %185 = vmax.xlane.f32.xlu2 %v184_v8  ;;  %255 = vset.pattern.permute.xlu0 %v299_v40  ;;  %v256_v50 = vld [vmem:[%s365_s2] ss:$0 sm:$0xff] }
   0xd   :  { %23 = vadd.xlane.f32.xlu0 %v22_v5 }
   0xe   :  { %197 = vmax.xlane.f32.xlu2 %v196_v11 }
  0x21   :  { %108 = vperm.xlu0 %255, %v105_v39  }
  0x78   :  { %v40_v7 = vpop.xlane.xlu0 %39 }
  0x79   :  { %v41_v9 = vmax.f32 %v40_v7, 1e-24  ;;  %v186_v33 = vpop.xlane.xlu2 %185 }
  0x7a   :  { %v187_v42 = vsub.f32 %v181_v6, %v186_v33 }
  0x7b   :  { %257 = vrsqrt.f32 %v41_v9  ;;  %vm48_vm3 = vweird.f32 %v41_v9 }
  0x7c   :  { %v188_v45 = vmul.f32 1.442695, %v187_v42 }
  0x80   :  { %v24_v12 = vpop.xlane.xlu0 %23 }
  0x81   :  { %v258_v13 = vpop.eup %257  ;;  %v25_v14 = vmax.f32 %v24_v12, 1e-24  ;;  %v198_v34 = vpop.xlane.xlu2 %197 }
  0x82   :  { %v43_v15 = vmul.f32 %v258_v13, %v41_v9  ;;  %vm49_vm2 = vweird.f32 %v258_v13  ;;  %v199_v35 = vsub.f32 %v182_v10, %v198_v34 }
  0x83   :  { %259 = vrsqrt.f32 %v25_v14  ;;  %vm50_vm4 = vmor %vm48_vm3, %vm49_vm2  ;;  %vm32_vm6 = vweird.f32 %v25_v14 }
  0x84   :  { %v44_v16 = vmul.f32 %v258_v13, %v43_v15  ;;  %v200_v36 = vmul.f32 1.442695, %v199_v35 }
  0x86   :  { %v45_v17 = vmul.f32 0.5, %v44_v16  ;;  %261 = vpow2.f32 %v200_v36 }
  0x88   :  { %v46_v18 = vsub.f32 1.5, %v45_v17 }
  0x89   :  { %v260_v19 = vpop.eup %259 }
  0x8a   :  { %v27_v20 = vmul.f32 %v260_v19, %v25_v14  ;;  %v47_v21 = vmul.f32 %v258_v13, %v46_v18  ;;  %vm33_vm5 = vweird.f32 %v260_v19 }
  0x8b   :  { %vm34_vm7 = vmor %vm32_vm6, %vm33_vm5  ;;  %vm169_vm6 = vcmask 7168  }
  0x8c   :  { %v28_v22 = vmul.f32 %v260_v19, %v27_v20  ;;  %v51_v23 = vsel %vm50_vm4, %v258_v13, %v47_v21  ;;  %v262_v37 = vpop.eup %261 }
  0x8d   :  { %v52_v24 = vmul.f32 %v51_v23, %v19_v0  ;;  %v202_v38 = vsel %vm183_vm1, %v262_v37, 0.0 }
  0x8e   :  { %v29_v25 = vmul.f32 0.5, %v28_v22  ;;  %203 = vadd.xlane.f32.xlu2 %v202_v38 }
  0x8f   :  { %245 = vmatpush.xpose.msk.msra.mxu0 %vm21_vm0, %v52_v24 }
  0x90   :  { %v30_v26 = vsub.f32 1.5, %v29_v25 }
  0x92   :  { %v31_v27 = vmul.f32 %v260_v19, %v30_v26 }
  0x93   :  { %v109_v51 = vpop.permute.xlu0 %108 }
  0x94   :  { %v35_v28 = vsel %vm34_vm7, %v260_v19, %v31_v27  ;;  %vm111_vm9 = vcmp.eq.s32.totalorder %v109_v51, %v256_v50 }
  0x95   :  { %v36_v29 = vmul.f32 %v35_v28, %v18_v2  ;;  %v247_v53 = vsel %vm111_vm9, 1.0, %v300_v52 }
  0x96   :  { %v129_v54 = vsel %vm80_vm8, %v247_v53, 0.0  ;;  %v114_v55 = vsub.f32 1.0, %v247_v53 }
  0x97   :  { %246 = vmatmul.msk.f32.vlgmr.msra.gmra.mxu0 %vm21_vm0, %v36_v29 }
  0x98   :  { %v150_v56 = vsel %vm80_vm8, %v114_v55, 0.0 }
  0x99   :  { %151 = vadd.xlane.f32.xlu2 %v150_v56 }
 0x101   :  { %v204_v58 = vpop.xlane.xlu2 %203 }
 0x114   :  { %v76_v30 = vpop.f32.mrf.mxu0 }
 0x115   :  { %v79_v31 = vmul.f32 10.0, %v76_v30 }
 0x117   :  { %v81_v32 = vsel %vm80_vm8, %v79_v31, -inf }
 0x118   :  { %82 = vmax.xlane.f32.xlu1 %v81_v32 }
 0x18b   :  { %v83_v41 = vpop.xlane.xlu1 %82 }
 0x18c   :  { %v84_v43 = vsub.f32 %v79_v31, %v83_v41 }
 0x18e   :  { %v85_v44 = vmul.f32 1.442695, %v84_v43 }
 0x190   :  { %263 = vpow2.f32 %v85_v44 }
 0x191   :  { %265 = vpow2.f32 %v188_v45 }
 0x196   :  { %v264_v46 = vpop.eup %263 }
 0x197   :  { %v87_v47 = vsel %vm80_vm8, %v264_v46, 0.0  ;;  %v266_v48 = vpop.eup %265 }
 0x198   :  { %88 = vadd.xlane.f32.xlu1 %v87_v47  ;;  %v190_v49 = vsel %vm183_vm1, %v266_v48, 0.0 }
 0x1a0   :  { %191 = vadd.xlane.f32.xlu1 %v190_v49 }
 0x1a8   :  { %130 = vadd.xlane.f32.xlu1 %v129_v54 }
 0x20b   :  { %v89_v57 = vpop.xlane.xlu1 %88 }
 0x20c   :  { %267 = vrcp.f32 %v89_v57  ;;  %v101_v63 = vand.u32 2147483648, %v89_v57  ;;  %v99_v1 = vand.u32 2147483647, %v89_v57  ;;  %vm95_vm11 = vweird.f32 %v89_v57 }
 0x20d   :  { %269 = vlog2.f32 %v204_v58 }
 0x20e   :  { %v102_v5 = vor.u32 1.1754944e-38, %v101_v63  ;;  %vm100_vm13 = vcmp.eq.f32.partialorder %v99_v1, 8.507059e+37 }
 0x212   :  { %v268_v59 = vpop.eup %267 }
 0x213   :  { %v91_v60 = vmul.f32 %v268_v59, %v89_v57  ;;  %v192_v61 = vpop.xlane.xlu1 %191  ;;  %vm96_vm10 = vweird.f32 %v268_v59  ;;  %v270_v2 = vpop.eup %269 }
 0x214   :  { %271 = vlog2.f32 %v192_v61  ;;  %vm97_vm12 = vmor %vm95_vm11, %vm96_vm10  ;;  %v206_v9 = vmul.f32 0.6931472, %v270_v2 }
 0x215   :  { %v92_v62 = vsub.f32 1.0, %v91_v60 }
 0x216   :  { %v207_v14 = vsub.f32 %v199_v35, %v206_v9  ;;  %v152_v35 = vpop.xlane.xlu2 %151 }
 0x217   :  { %v93_v0 = vmul.f32 %v268_v59, %v92_v62  ;;  %vm158_vm0 = vweird.f32 %v152_v35  ;;  %v164_v45 = vand.u32 2147483648, %v152_v35  ;;  %v162_v49 = vand.u32 2147483647, %v152_v35 }
 0x218   :  { %v209_v17 = vmul.f32 1.442695, %v207_v14 }
 0x219   :  { %v94_v3 = vadd.f32 %v268_v59, %v93_v0  ;;  %v165_v51 = vor.u32 1.1754944e-38, %v164_v45  ;;  %vm163_vm5 = vcmp.eq.f32.partialorder %v162_v49, 8.507059e+37 }
 0x21a   :  { %v272_v4 = vpop.eup %271 }
 0x21b   :  { %v98_v6 = vsel %vm97_vm12, %v268_v59, %v94_v3  ;;  %v194_v7 = vmul.f32 0.6931472, %v272_v4  ;;  %v131_v34 = vpop.xlane.xlu1 %130 }
 0x21c   :  { %v103_v8 = vsel %vm100_vm13, %v102_v5, %v98_v6  ;;  %vm137_vm14 = vweird.f32 %v131_v34  ;;  %v143_v44 = vand.u32 2147483648, %v131_v34  ;;  %v141_v47 = vand.u32 2147483647, %v131_v34 }
 0x21d   :  { %v104_v10 = vmul.f32 %v264_v46, %v103_v8  ;;  %v195_v11 = vsub.f32 %v187_v42, %v194_v7 }
 0x21e   :  { %v144_v50 = vor.u32 1.1754944e-38, %v143_v44  ;;  %vm142_vm4 = vcmp.eq.f32.partialorder %v141_v47, 8.507059e+37 }
 0x21f   :  { %v115_v12 = vadd.f32 1e-10, %v104_v10  ;;  %v120_v13 = vsub.f32 1.0, %v104_v10  ;;  %v211_v16 = vmul.f32 1.442695, %v195_v11  ;;  %v208_v31 = vsub.f32 %v207_v14, %v195_v11 }
 0x221   :  { %v121_v15 = vadd.f32 1e-10, %v120_v13  ;;  %273 = vlog2.f32 %v115_v12 }
 0x223   :  { %275 = vlog2.f32 %v121_v15 }
 0x224   :  { %277 = vpow2.f32 %v211_v16 }
 0x225   :  { %279 = vpow2.f32 %v209_v17 }
 0x226   :  { %281 = vrcp.f32 %v131_v34 }
 0x227   :  { %v274_v18 = vpop.eup %273  ;;  %283 = vrcp.f32 %v152_v35 }
 0x228   :  { %v117_v20 = vmul.f32 0.6931472, %v274_v18 }
 0x229   :  { %v276_v19 = vpop.eup %275 }
 0x22a   :  { %v123_v21 = vmul.f32 0.6931472, %v276_v19  ;;  %v118_v22 = vsub.f32 0.0, %v117_v20  ;;  %v278_v24 = vpop.eup %277 }
 0x22b   :  { %v280_v27 = vpop.eup %279 }
 0x22c   :  { %v124_v23 = vsub.f32 0.0, %v123_v21  ;;  %v119_v25 = vmul.f32 %v247_v53, %v118_v22  ;;  %v213_v30 = vsub.f32 %v280_v27, %v278_v24  ;;  %v282_v36 = vpop.eup %281 }
 0x22d   :  { %v284_v37 = vpop.eup %283  ;;  %v133_v38 = vmul.f32 %v282_v36, %v131_v34  ;;  %vm138_vm15 = vweird.f32 %v282_v36 }
 0x22e   :  { %v125_v26 = vmul.f32 %v124_v23, %v114_v55  ;;  %v126_v28 = vsel %vm80_vm8, %v119_v25, 0.0  ;;  %v214_v32 = vmul.f32 %v213_v30, %v208_v31  ;;  %v154_v39 = vmul.f32 %v284_v37, %v152_v35 }
 0x22f   :  { %127 = vadd.xlane.f32.xlu1 %v126_v28  ;;  %v134_v40 = vsub.f32 1.0, %v133_v38  ;;  %vm159_vm2 = vweird.f32 %v284_v37 }
 0x230   :  { %v147_v29 = vsel %vm80_vm8, %v125_v26, 0.0  ;;  %v215_v33 = vsel %vm183_vm1, %v214_v32, 0.0  ;;  %v155_v41 = vsub.f32 1.0, %v154_v39  ;;  %vm139_vm1 = vmor %vm137_vm14, %vm138_vm15 }
 0x231   :  { %148 = vadd.xlane.f32.xlu2 %v147_v29  ;;  %v135_v42 = vmul.f32 %v282_v36, %v134_v40  ;;  %vm160_vm3 = vmor %vm158_vm0, %vm159_vm2 }
 0x232   :  { %v156_v43 = vmul.f32 %v284_v37, %v155_v41 }
 0x233   :  { %v136_v46 = vadd.f32 %v282_v36, %v135_v42 }
 0x234   :  { %v157_v48 = vadd.f32 %v284_v37, %v156_v43 }
 0x235   :  { %v140_v52 = vsel %vm139_vm1, %v282_v36, %v136_v46 }
 0x236   :  { %v161_v53 = vsel %vm160_vm3, %v284_v37, %v157_v48  ;;  %v145_v55 = vsel %vm142_vm4, %v144_v50, %v140_v52 }
 0x237   :  { %v166_v56 = vsel %vm163_vm5, %v165_v51, %v161_v53 }
 0x239   :  { %216 = vadd.xlane.f32.xlu2 %v215_v33 }
 0x2a2   :  { %v128_v54 = vpop.xlane.xlu1 %127 }
 0x2a3   :  { %v146_v58 = vmul.f32 %v145_v55, %v128_v54 }
 0x2a4   :  { %v149_v57 = vpop.xlane.xlu2 %148 }
 0x2a5   :  { %v167_v59 = vmul.f32 %v166_v56, %v149_v57 }
 0x2a7   :  { %v168_v60 = vadd.f32 %v167_v59, %v146_v58 }
 0x2a9   :  { %v170_v61 = vsel %vm169_vm6, %v168_v60, 0.0 }
 0x2aa   :  { %171 = vadd.xlane.f32.xlu1 %v170_v61 }
 0x2ac   :  { %v217_v62 = vpop.xlane.xlu2 %216 }
 0x2ad   :  { %v218_v63 = vrot.slane %v217_v62, 4 }
 0x2af   :  { %v219_v0 = vadd.f32 %v218_v63, %v217_v62 }
 0x2b1   :  { %v220_v1 = vrot.slane %v219_v0, 2 }
 0x2b3   :  { %v221_v5 = vadd.f32 %v220_v1, %v219_v0 }
 0x2b5   :  { %v222_v8 = vrot.slane %v221_v5, 1 }
 0x2b7   :  { %v223_v11 = vadd.f32 %v222_v8, %v221_v5 }
 0x31d   :  { %v172_v2 = vpop.xlane.xlu1 %171 }
 0x31e   :  { %v173_v3 = vrot.slane %v172_v2, 4 }
 0x320   :  { %v174_v4 = vadd.f32 %v173_v3, %v172_v2 }
 0x322   :  { %v175_v6 = vrot.slane %v174_v4, 2 }
 0x324   :  { %v176_v7 = vadd.f32 %v175_v6, %v174_v4 }
 0x326   :  { %v177_v9 = vrot.slane %v176_v7, 1 }
 0x328   :  { %v178_v10 = vadd.f32 %v177_v9, %v176_v7 }
 0x32a   :  { %248 = vpush %v178_v10 }
 0x32b   :  { %250 = vpush %v223_v11 }
 0x35b   :  { %s249_s2 = spop %248 }
 0x35c   :  { %s251_s24 = spop %250  ;;  %s180_s29 = smul.f32 0.125, %s249_s2 }
 0x35d   :  { %s225_s25 = smul.f32 0.5, %s251_s24 }
 0x35f   :  { %s226_s30 = smul.f32 0.125, %s225_s25 }
 0x361   :  { %s227_s5 = sadd.f32 %s226_s30, %s180_s29 }
 0x363   :  { %229 = sst [smem:[#allocation2]] %s227_s5 }
 0x364   :  { %238 = dma.smem_to_hbm %s301_s6, 16, %s236_s28, [#allocation3]  }
 0x365   :  { %297 = dma.done.wait [#allocation3], 16  }
 0x366   :  { %298 = vsyncadd [#allocation3], 4294967280 }
 0x367   :  { %243 = sfence }
 0x368   :  { %244 = vsyncpa [#allocation3], 1 }

</bundles_post_ra>
